<compile_context>
chip_gen: v7x
topology: tpu7x:2x2x1
jax: 0.10.0
libtpu: 0.0.40
codegen_flags: <defaults>
</compile_context>

<pallas_src>
import functools
import math

import jax
import jax.numpy as jnp
from jax.experimental import pallas as pl
from jax.experimental.pallas import tpu as pltpu


def _round_up(n, m):
    return ((n + m - 1) // m) * m


def _head_kernel(x_ref, w_ref, out_ref, wei_ref, *,
                 batch_block, seq_len, head_size, head_pad, decoding):
    # x_ref:  (Bb*T, C)          w_ref:   (C, 3*Hp)   fused, lane-padded [Wk|Wq|Wv]
    # out_ref:(1, Bb, out_lp)    wei_ref: (1, Bb, wei_lp)   lane-dense slabs
    Bb, T, H, Hp = batch_block, seq_len, head_size, head_pad

    # Fused QKV projection; batch*seq already folded into the matmul M dim
    # wrapper-side.  Operands stay in their native (possibly bf16) dtype with
    # f32 accumulation on the MXU.
    x2d = x_ref[...]
    kqv = jnp.dot(x2d, w_ref[...], preferred_element_type=jnp.float32)  # (Bb*T, 3*Hp)
    kqv = kqv.astype(x2d.dtype)                    # native dtype for MXU reuse

    # Projections are padded to 128-lane boundaries in the fused weight, so
    # these slices start lane-aligned (no cross-lane relayout).
    k = kqv[:, 0 * Hp:0 * Hp + H].reshape(Bb, T, H)
    q = kqv[:, 1 * Hp:1 * Hp + H].reshape(Bb, T, H)
    v = kqv[:, 2 * Hp:2 * Hp + H].reshape(Bb, T, H)

    # Scale q (Bb*T*H elements) rather than wei (Bb*T*T elements).
    q = q * jnp.asarray(H ** -0.5, dtype=q.dtype)

    # q @ k^T contracting the last dims directly (no explicit transpose).
    wei = jnp.einsum("bqd,bkd->bqk", q, k,
                     preferred_element_type=jnp.float32)               # (Bb, T, T) f32

    if decoding:
        # Causal mask (diagonal always kept -> no fully-masked rows / NaNs).
        row = jax.lax.broadcasted_iota(jnp.int32, (T, T), 0)
        col = jax.lax.broadcasted_iota(jnp.int32, (T, T), 1)
        wei = jnp.where((col <= row)[None, :, :], wei, -jnp.inf)

    # Softmax in f32 with exact normalization so the returned map's rows sum
    # to 1 (matches the PyTorch reference); the (Bb,T,1) divide is negligible.
    wei = jnp.exp(wei - jnp.max(wei, axis=-1, keepdims=True))
    wei = wei / jnp.sum(wei, axis=-1, keepdims=True)

    out = jnp.einsum("bqk,bkd->bqd", wei.astype(v.dtype), v,
                     preferred_element_type=jnp.float32)                # (Bb, T, H)

    # Lane-dense stores: flatten trailing dims into lanes and zero-pad up to
    # the >=128-multiple block width -> full unmasked vector stores.
    def _store(ref, val2d, width):
        pad = ref.shape[-1] - width
        val2d = val2d.astype(ref.dtype)
        if pad:
            zeros = jnp.zeros((val2d.shape[0], pad), dtype=ref.dtype)
            val2d = jnp.concatenate([val2d, zeros], axis=-1)
        ref[0] = val2d

    _store(out_ref, out.reshape(Bb, T * H), T * H)
    _store(wei_ref, wei.reshape(Bb, T * T), T * T)


def _pick_batch_block(B, T, target_rows=512):
    """Batch-block size: >=2 grid steps when B allows (v7x megacore /
    pipelining), ~target_rows matmul rows per step, divides B, and keeps the
    x block sublane-aligned (Bb*T % 8 == 0) whenever possible."""
    cap = max(1, B // 2)                          # guarantee a >=2-step grid
    bb = max(1, min(cap, max(1, target_rows // max(T, 1))))
    while bb > 1 and B % bb:
        bb -= 1
    # x block is (Bb*T, C): its sublane dim should be a multiple of 8 unless
    # we take the whole batch in a single step (block == full array dims).
    while bb < B and (bb * T) % 8 != 0:
        bb += 1
        while bb < B and B % bb:
            bb += 1
    if (bb * T) % 8 != 0:
        bb = B
    return bb


def head_attention(x, wk, wq, wv, *, decoding=False, batch_block=None,
                   compute_dtype=None, map_dtype=None):
    """Single attention head.  Returns (out, wei): out=(B,T,H), wei=(B,T,T)."""
    B, T, C = x.shape
    H = wk.shape[1]
    out_dtype = x.dtype
    wei_dtype = map_dtype if map_dtype is not None else x.dtype
    mxu_dtype = compute_dtype if compute_dtype is not None else x.dtype

    # Fuse the three projection weights into one matmul RHS, each padded to a
    # 128-lane boundary so the in-kernel k/q/v slices start lane-aligned.
    # (PyTorch nn.Linear stores (H, C) and does x @ W.T; weights here are
    #  stored (C, H), so x @ W is mathematically identical.)
    Hp = _round_up(H, 128)
    w_kqv = jnp.zeros((C, 3 * Hp), dtype=mxu_dtype)
    w_kqv = w_kqv.at[:, 0 * Hp:0 * Hp + H].set(wk.astype(mxu_dtype))
    w_kqv = w_kqv.at[:, 1 * Hp:1 * Hp + H].set(wq.astype(mxu_dtype))
    w_kqv = w_kqv.at[:, 2 * Hp:2 * Hp + H].set(wv.astype(mxu_dtype))

    Bb = batch_block if batch_block is not None else _pick_batch_block(B, T)
    assert B % Bb == 0, "batch block must divide batch"
    n_blocks = B // Bb

    # Wrapper-side layout plumbing (free): fold batch*seq into the matmul M
    # dim; outputs are lane-dense 2-D slabs reshaped back after the call.
    x2d = x.reshape(B * T, C).astype(mxu_dtype)
    out_lanes, wei_lanes = T * H, T * T
    out_lp = _round_up(out_lanes, 128)
    wei_lp = _round_up(wei_lanes, 128)

    kernel = functools.partial(_head_kernel, batch_block=Bb, seq_len=T,
                               head_size=H, head_pad=Hp, decoding=decoding)

    out_shapes = (
        jax.ShapeDtypeStruct((n_blocks, Bb, out_lp), out_dtype),
        jax.ShapeDtypeStruct((n_blocks, Bb, wei_lp), wei_dtype),
    )

    grid_spec = pltpu.PrefetchScalarGridSpec(
        num_scalar_prefetch=0,
        grid=(n_blocks,),
        in_specs=[
            pl.BlockSpec((Bb * T, C), lambda b: (b, 0)),       # x rows for this block
            pl.BlockSpec((C, 3 * Hp), lambda b: (0, 0)),       # fused W_kqv (resident)
        ],
        out_specs=[
            pl.BlockSpec((1, Bb, out_lp), lambda b: (b, 0, 0)),  # lane-dense out slab
            pl.BlockSpec((1, Bb, wei_lp), lambda b: (b, 0, 0)),  # lane-dense map slab
        ],
    )

    # Rough per-step VMEM footprint (double-buffered blocks + f32 temps) with
    # a generation-aware cap: stay below v7x's 64 MiB physical VMEM; v5e/v6e
    # (128 MiB physical) have headroom at this limit as well.
    isz = jnp.dtype(mxu_dtype).itemsize
    osz = jnp.dtype(out_dtype).itemsize
    wsz = jnp.dtype(wei_dtype).itemsize
    rows = Bb * T
    est = (2 * (rows * C * isz + C * 3 * Hp * isz
                + Bb * out_lp * osz + Bb * wei_lp * wsz)
           + rows * 3 * Hp * 4 + 2 * Bb * T * T * 4 + Bb * T * H * 4)
    vmem_limit = int(min(max(4 * est, 32 * 1024 * 1024), 64 * 1024 * 1024))

    cost = pl.CostEstimate(
        flops=2 * B * T * C * (3 * Hp) + 4 * B * T * T * H,
        transcendentals=B * T * T,
        bytes_accessed=(B * T * C * isz + C * 3 * Hp * isz
                        + B * out_lp * osz + B * wei_lp * wsz),
    )

    out2d, wei2d = pl.pallas_call(
        kernel,
        out_shape=out_shapes,
        grid_spec=grid_spec,
        compiler_params=pltpu.CompilerParams(
            dimension_semantics=("parallel",),     # megacore-shardable on v7x
            vmem_limit_bytes=vmem_limit,
        ),
        cost_estimate=cost,
    )(x2d, w_kqv)

    out = out2d.reshape(B, out_lp)[:, :out_lanes].reshape(B, T, H)
    wei = wei2d.reshape(B, wei_lp)[:, :wei_lanes].reshape(B, T, T)
    return out, wei


def _reference(x, wk, wq, wv, decoding):
    # Pure-JAX reference mirroring the PyTorch forward.
    k = x @ wk
    q = x @ wq
    v = x @ wv
    wei = (q @ jnp.swapaxes(k, -2, -1)) * (k.shape[-1] ** -0.5)
    if decoding:
        T = x.shape[1]
        tril = jnp.tril(jnp.ones((T, T)))
        wei = jnp.where(tril == 0, -jnp.inf, wei)
    wei = jax.nn.softmax(wei, axis=-1)
    out = wei @ v
    return out, wei


if __name__ == "__main__":
    # Module hyperparameters (synthetic, deterministic).
    B, block_size, n_embd, head_size = 2, 8, 32, 16
    T = block_size

    key = jax.random.PRNGKey(0)
    kx, kk, kq, kv = jax.random.split(key, 4)

    x = jax.random.normal(kx, (B, T, n_embd), dtype=jnp.float32)
    # nn.Linear(n_embd, head_size, bias=False) weights, stored as (C, H).
    wk = jax.random.normal(kk, (n_embd, head_size), dtype=jnp.float32) / math.sqrt(n_embd)
    wq = jax.random.normal(kq, (n_embd, head_size), dtype=jnp.float32) / math.sqrt(n_embd)
    wv = jax.random.normal(kv, (n_embd, head_size), dtype=jnp.float32) / math.sqrt(n_embd)

    attention_maps = []  # mirrors the PyTorch `attention_maps` list argument

    # Tolerance covers TPU matmul precision-mode differences between the
    # in-kernel MXU path and XLA's default-precision reference matmuls.
    TOL = dict(atol=2e-2, rtol=2e-2)

    # Encoder mode (decoding=False, default in __init__).
    out, wei = head_attention(x, wk, wq, wv, decoding=False)
    jax.block_until_ready((out, wei))
    attention_maps.append(wei)

    out_ref, wei_ref = _reference(x, wk, wq, wv, decoding=False)
    assert out.shape == (B, T, head_size) and wei.shape == (B, T, T)
    assert jnp.allclose(out, out_ref, **TOL)
    assert jnp.allclose(wei, wei_ref, **TOL)
    # Exact in-kernel softmax normalization: rows of the returned map sum to 1.
    assert jnp.allclose(jnp.sum(wei, axis=-1), 1.0, atol=1e-3)

    # Decoding mode (causal mask applied in-kernel).
    out_d, wei_d = head_attention(x, wk, wq, wv, decoding=True)
    jax.block_until_ready((out_d, wei_d))
    attention_maps.append(wei_d)

    out_dr, wei_dr = _reference(x, wk, wq, wv, decoding=True)
    assert jnp.allclose(out_d, out_dr, **TOL)
    assert jnp.allclose(wei_d, wei_dr, **TOL)

    # bf16 MXU operands (v6e/v7x fast path); accumulation & softmax stay f32.
    out_b, wei_b = head_attention(x, wk, wq, wv, decoding=False,
                                  compute_dtype=jnp.bfloat16)
    jax.block_until_ready((out_b, wei_b))
    BF_TOL = dict(atol=1e-1, rtol=1e-1)
    assert jnp.allclose(out_b, out_ref, **BF_TOL)
    assert jnp.allclose(wei_b, wei_ref, **BF_TOL)

    print("KERNEL_OK")
</pallas_src>

<mosaic_0001>
module attributes {stable_mosaic.version = 11 : i64} {
  func.func @_head_kernel(%arg0: i32, %arg1: memref<8x32xf32, #tpu.memory_space<vmem>>, %arg2: memref<32x384xf32, #tpu.memory_space<vmem>>, %arg3: memref<1x1x128xf32, #tpu.memory_space<vmem>>, %arg4: memref<1x1x128xf32, #tpu.memory_space<vmem>>) attributes {dimension_semantics = [#tpu.dimension_semantics<parallel>], iteration_bounds = array<i64: 2>, scalar_prefetch = 0 : i64, scratch_operands = 0 : i64, tpu.core_type = #tpu.core_type<tc>, window_params = [{transform_indices = @transform_0, window_bounds = array<i64: 8, 32>}, {pipeline_mode = #tpu.pipeline_mode<synchronous>, transform_indices = @transform_1, window_bounds = array<i64: 32, 384>}, {transform_indices = @transform_2, window_bounds = array<i64: 1, 1, 128>}, {transform_indices = @transform_3, window_bounds = array<i64: 1, 1, 128>}]} {
    %c0 = arith.constant 0 : index
    %c0_0 = arith.constant 0 : index
    %0 = vector.load %arg1[%c0, %c0_0] : memref<8x32xf32, #tpu.memory_space<vmem>>, vector<8x32xf32>
    %c0_1 = arith.constant 0 : index
    %c0_2 = arith.constant 0 : index
    %1 = vector.load %arg2[%c0_1, %c0_2] : memref<32x384xf32, #tpu.memory_space<vmem>>, vector<32x384xf32>
    %cst = arith.constant dense<0.000000e+00> : vector<8x384xf32>
    %2 = tpu.matmul %0, %1, %cst {dimension_numbers = #tpu.dot_dimension_numbers<[1], [0], [0], [1], [0, 0, 1, 1], [], []>} : vector<8x32xf32>, vector<32x384xf32>, vector<8x384xf32> -> vector<8x384xf32>
    %3 = vector.extract_strided_slice %2 {offsets = [0, 0], sizes = [8, 16], strides = [1, 1]} : vector<8x384xf32> to vector<8x16xf32>
    %4 = vector.shape_cast %3 : vector<8x16xf32> to vector<1x8x16xf32>
    %5 = vector.extract_strided_slice %2 {offsets = [0, 128], sizes = [8, 16], strides = [1, 1]} : vector<8x384xf32> to vector<8x16xf32>
    %6 = vector.shape_cast %5 : vector<8x16xf32> to vector<1x8x16xf32>
    %7 = vector.extract_strided_slice %2 {offsets = [0, 256], sizes = [8, 16], strides = [1, 1]} : vector<8x384xf32> to vector<8x16xf32>
    %8 = vector.shape_cast %7 : vector<8x16xf32> to vector<1x8x16xf32>
    %cst_3 = arith.constant 2.500000e-01 : f32
    %9 = vector.broadcast %cst_3 : f32 to vector<1x8x16xf32>
    %10 = arith.mulf %6, %9 : vector<1x8x16xf32>
    "tpu.trace_start"() <{level = 10 : i32, message = "bqd,bkd->bqk"}> : () -> ()
    %cst_4 = arith.constant dense<0.000000e+00> : vector<1x8x8xf32>
    %11 = tpu.matmul %10, %4, %cst_4 {dimension_numbers = #tpu.dot_dimension_numbers<[2], [2], [1], [1], [0, 0, 0, 1, 1, 1], [0], [0]>} : vector<1x8x16xf32>, vector<1x8x16xf32>, vector<1x8x8xf32> -> vector<1x8x8xf32>
    "tpu.trace_stop"() : () -> ()
    %cst_5 = arith.constant dense<0xFF800000> : vector<1x8xf32>
    %12 = vector.multi_reduction <maximumf>, %11, %cst_5 [2] : vector<1x8x8xf32> to vector<1x8xf32>
    %13 = vector.shape_cast %12 : vector<1x8xf32> to vector<1x8x1xf32>
    %14 = vector.broadcast %13 : vector<1x8x1xf32> to vector<1x8x8xf32>
    %15 = arith.subf %11, %14 : vector<1x8x8xf32>
    %16 = math.exp %15 : vector<1x8x8xf32>
    %cst_6 = arith.constant dense<0.000000e+00> : vector<1x8xf32>
    %17 = vector.multi_reduction <add>, %16, %cst_6 [2] : vector<1x8x8xf32> to vector<1x8xf32>
    %18 = vector.shape_cast %17 : vector<1x8xf32> to vector<1x8x1xf32>
    %19 = vector.broadcast %18 : vector<1x8x1xf32> to vector<1x8x8xf32>
    %20 = arith.divf %16, %19 : vector<1x8x8xf32>
    "tpu.trace_start"() <{level = 10 : i32, message = "bqk,bkd->bqd"}> : () -> ()
    %cst_7 = arith.constant dense<0.000000e+00> : vector<1x8x16xf32>
    %21 = tpu.matmul %20, %8, %cst_7 {dimension_numbers = #tpu.dot_dimension_numbers<[2], [1], [1], [2], [0, 0, 0, 1, 1, 2], [0], [0]>} : vector<1x8x8xf32>, vector<1x8x16xf32>, vector<1x8x16xf32> -> vector<1x8x16xf32>
    "tpu.trace_stop"() : () -> ()
    %22 = vector.shape_cast %21 : vector<1x8x16xf32> to vector<1x128xf32>
    %c0_8 = arith.constant 0 : index
    %c0_9 = arith.constant 0 : index
    %c0_10 = arith.constant 0 : index
    %23 = vector.load %arg3[%c0_8, %c0_9, %c0_10] : memref<1x1x128xf32, #tpu.memory_space<vmem>>, vector<1x1x128xf32>
    %24 = vector.shape_cast %23 : vector<1x1x128xf32> to vector<1x128xf32>
    %25 = vector.shape_cast %22 : vector<1x128xf32> to vector<1x1x128xf32>
    tpu.vector_store %arg3[%c0_8, %c0_9, %c0_10], %25 {strides = array<i32>} : memref<1x1x128xf32, #tpu.memory_space<vmem>>, vector<1x1x128xf32>,
    %26 = vector.shape_cast %20 : vector<1x8x8xf32> to vector<1x64xf32>
    %cst_11 = arith.constant 0.000000e+00 : f32
    %27 = vector.broadcast %cst_11 : f32 to vector<1x64xf32>
    %28 = tpu.concatenate %26, %27 in 1 : vector<1x64xf32>, vector<1x64xf32> -> vector<1x128xf32>
    %c0_12 = arith.constant 0 : index
    %c0_13 = arith.constant 0 : index
    %c0_14 = arith.constant 0 : index
    %29 = vector.load %arg4[%c0_12, %c0_13, %c0_14] : memref<1x1x128xf32, #tpu.memory_space<vmem>>, vector<1x1x128xf32>
    %30 = vector.shape_cast %29 : vector<1x1x128xf32> to vector<1x128xf32>
    %31 = vector.shape_cast %28 : vector<1x128xf32> to vector<1x1x128xf32>
    tpu.vector_store %arg4[%c0_12, %c0_13, %c0_14], %31 {strides = array<i32>} : memref<1x1x128xf32, #tpu.memory_space<vmem>>, vector<1x1x128xf32>,
    return
  }
  func.func @transform_0(%arg0: i32) -> (i32, i32) {
    %c0_i32 = arith.constant 0 : i32
    %c0_i32_0 = arith.constant 0 : i32
    return %arg0, %c0_i32 : i32, i32
  }
  func.func @transform_1(%arg0: i32) -> (i32, i32) {
    %c0_i32 = arith.constant 0 : i32
    %c0_i32_0 = arith.constant 0 : i32
    %c0_i32_1 = arith.constant 0 : i32
    return %c0_i32, %c0_i32_0 : i32, i32
  }
  func.func @transform_2(%arg0: i32) -> (i32, i32, i32) {
    %c0_i32 = arith.constant 0 : i32
    %c0_i32_0 = arith.constant 0 : i32
    %c0_i32_1 = arith.constant 0 : i32
    return %arg0, %c0_i32, %c0_i32_0 : i32, i32, i32
  }
  func.func @transform_3(%arg0: i32) -> (i32, i32, i32) {
    %c0_i32 = arith.constant 0 : i32
    %c0_i32_0 = arith.constant 0 : i32
    %c0_i32_1 = arith.constant 0 : i32
    return %arg0, %c0_i32, %c0_i32_0 : i32, i32, i32
  }
}

</mosaic_0001>

<bundles_post_ra>
// kernel: tpu_custom_call.1
= control target key start
LH: loop header
LB: loop body
LE: loop exit
PB: predicated region body
PF: predicated region fallthrough
CT: control target
= control target key end

     0   :  { %9 = vsyncpa [#allocation3], 0  ;;  %s1461_s0 = inlined_call_operand.hbm [shape: f32[16,32], index: 0, kind: input, shape index: {}]   ;;  %s1462_s1 = inlined_call_operand.hbm [shape: f32[32,384], index: 1, kind: input, shape index: {}]   ;;  %s1463_s2 = inlined_call_operand.hbm [shape: f32[2,1,128], index: 2, kind: output, shape index: {0}]   ;;  %s1464_s3 = inlined_call_operand.hbm [shape: f32[2,1,128], index: 3, kind: output, shape index: {1}]  }
   0x1   :  { %11 = vsyncpa [#allocation3 + $0x1], 0 }
   0x2   :  { %12 = vsyncpa [#allocation6], 0 }
   0x3   :  { %13 = vsyncpa [#allocation4], 0 }
   0x4   :  { %15 = vsyncpa [#allocation4 + $0x1], 0 }
   0x5   :  { %16 = vsyncpa [#allocation9], 0 }
   0x6   :  { %18 = vsyncpa [#allocation9 + $0x1], 0  ;;  %s1194_s12 = smov 0   ;;  %s1196_s13 = smov 0  }
   0x7   :  { %s1198_s14 = smov 0   ;;  %s1200_s15 = smov 0  }
   0x8 LB: > { %s1215_s16 = sadd.s32 4294967295, %s1150_s15   ;;  %s844_s17 = sadd.s32 4294967294, %s1150_s15   ;;  %s1150_s15 = sphi %s1200_s15, %s1484_s15   ;;  %s1146_s14 = sphi %s1198_s14, %s1483_s14   ;;  %s1142_s13 = sphi %s1196_s13, %s1482_s13   ;;  %s1138_s12 = sphi %s1194_s12, %s1481_s12  }
   0x9   : > { %p44_p0 = scmp.ne.s32.totalorder %s1142_s13, %s1138_s12  ;;  %p1465_p1 = scmp.eq.s32.totalorder %s1215_s16, 0 }
   0xa   : > { %p95_p3 = scmp.eq.s32.totalorder %s844_s17, 1  ;;  %p845_p5 = scmp.ge.s32.totalorder %s1150_s15, 1 }
   0xb   : > { %p1224_p4 = por %p1465_p1, %p44_p0  ;;  %p128_p7 = scmp.lt.s32.totalorder %s1150_s15, 3 }
   0xc   : > { %p1229_p6 = por %p95_p3, %p44_p0  ;;  %s1152_s21 = smov [#allocation5]  }
   0xd   : > { %s1468_s18 = scalar_select %p1224_p4, 1, 0 }
   0xe   : > { %s1469_s19 = scalar_select %p1229_p6, 1, 0 }
   0xf   : > { %p1234_p8 = pnand %p845_p5, %p128_p7  ;;  %s140_s22 = sshll.u32 %s1152_s21, 4  ;;  %s1238_s22 = int_to_ptr.vmem [resolvable:$true] %s140_s22 }
  0x10   : > { %s1250_s24 = sadd.s32 1, %s1150_s15   ;;  %s31_s25 = sadd.s32 1, %s1146_s14 }
  0x11   : > { %s1470_s20 = scalar_select %p1234_p8, 1, 0 }
  0x12   : > { %p916_p9 = pneg %p1234_p8  ;;  %s28_s26 = ssub.s32 %s1150_s15, %s1250_s24 }
  0x13   : > { %s990_s29 = scalar_lea.hbm %s1462_s1, 1536 }
  0x14   : > { %p1245_p11 = pnand %p916_p9, %p1465_p1  ;;  %p991_p12 = scmp.ne.s32.totalorder %s1462_s1, %s990_s29 }
  0x15   : > { %p997_p5 = scmp.lt.u32.totalorder %s990_s29, %s1462_s1 }
  0x16   : > { %p992_p13 = pneg %p1245_p11 }
  0x18   : > { %p993_p0 = pnand %p992_p13, %p991_p12 }
  0x1a   : > { %p994_p3 = pneg %p993_p0 }
  0x1c   : > { %p999_p7 = pnand %p997_p5, %p994_p3 }
  0x1e   : > { %1002 = shalt.err (!%p999_p7)
}
  0x1f   : > { %s1003_s7 = scalar_lea.vmem %s1238_s22, 1536  ;;  %p1011_p2 = scmp.lt.s32.totalorder %s1238_s22, %s1238_s22 }
  0x20   : > { %p1004_p9 = scmp.ne.s32.totalorder %s1238_s22, %s1003_s7  ;;  %p1012_p6 = scmp.lt.s32.totalorder %s1003_s7, %s1003_s7 }
  0x22   : > { %p1006_p10 = pnand %p1004_p9, %p992_p13  ;;  %p1013_p4 = por %p1012_p6, %p1011_p2 }
  0x24   : > { %p1007_p1 = pneg %p1006_p10 }
  0x26   : > { %p1014_p8 = pnand %p1013_p4, %p1007_p1 }
  0x28   : > { %1017 = shalt.err (!%p1014_p8)
}
  0x29   : > { %s1153_s8 = smov 384   ;;  %s1154_s9 = smov 24  }
  0x2a   : > { %919 = dma.hbm_to_vmem [thread:$0]  (!%p1245_p11), %s1462_s1, 1536, %s1238_s22, [#allocation6], %s1153_s8, %s1153_s8, %s1154_s9  }
  0x2b   : > { %p29_p2 = scmp.eq.s32.totalorder %s28_s26, 0  ;;  %p38_p1 = scmp.ne.s32.totalorder %s1146_s14, %s1142_s13 }
  0x2c   : > { %p39_p4 = scmp.eq.s32.totalorder %s1150_s15, 0  ;;  %p932_p6 = scmp.lt.s32.totalorder %s1150_s15, 2 }
  0x2d   : > { %s1281_s17 = scalar_select %p29_p2, %s1146_s14, %s31_s25  }
  0x2e   : > { %p40_p8 = por %p39_p4, %p38_p1  ;;  %p1472_p10 = scmp.eq.s32.totalorder %s1215_s16, 1 }
  0x2f   : > { %s154_s27 = sand.u32 1, %s1146_s14   ;;  %s849_s28 = sshll.u32 %s1150_s15, 7 }
  0x30   : > { %p1285_p12 = por %p1472_p10, %p38_p1  ;;  %s848_s29 = sshll.u32 %s154_s27, 3 }
  0x31   : > { %s1294_s4 = scalar_lea.hbm %s1461_s0, %s849_s28  ;;  %s158_s22 = scalar_lea.vmem [#allocation2], %s848_s29 }
  0x32   : > { %s165_s25 = sshll.u32 %s158_s22, 4  ;;  %p1296_p11 = pnand %p932_p6, %p40_p8  ;;  %s1300_s25 = int_to_ptr.vmem [resolvable:$true] %s165_s25 }
  0x33   : > { %s155_s5 = scalar_lea.sflag [#allocation3], %s154_s27  ;;  %s1018_s6 = scalar_lea.hbm %s1294_s4, 128 }
  0x34   : > { %p1019_p13 = scmp.ne.s32.totalorder %s1294_s4, %s1018_s6  ;;  %p1020_p0 = pneg %p1296_p11 }
  0x35   : > { %s1023_s9 = scalar_lea.hbm %s1461_s0, 256  ;;  %p1024_p7 = scmp.lt.u32.totalorder %s1294_s4, %s1461_s0 }
  0x36   : > { %p1021_p3 = pnand %p1020_p0, %p1019_p13  ;;  %p1025_p9 = scmp.lt.u32.totalorder %s1023_s9, %s1018_s6 }
  0x37   : > { %p1027_p1 = scmp.lt.u32.totalorder %s1018_s6, %s1294_s4 }
  0x38   : > { %p1022_p5 = pneg %p1021_p3  ;;  %p1026_p2 = por %p1025_p9, %p1024_p7 }
  0x3a   : > { %p1028_p4 = por %p1027_p1, %p1026_p2 }
  0x3c   : > { %p1029_p6 = pnand %p1028_p4, %p1022_p5 }
  0x3e   : > { %1032 = shalt.err (!%p1029_p6)
}
  0x3f   : > { %s1033_s27 = scalar_lea.vmem %s1300_s25, 128  ;;  %s1155_s28 = smov [#allocation2]  }
  0x40   : > { %p1034_p8 = scmp.ne.s32.totalorder %s1300_s25, %s1033_s27  ;;  %s1038_s29 = sshll.u32 %s1155_s28, 4  ;;  %s1039_s29 = int_to_ptr.vmem [resolvable:$false] %s1038_s29 }
  0x41   : > { %s1040_s23 = scalar_lea.vmem %s1039_s29, 256  ;;  %p1041_p3 = scmp.lt.s32.totalorder %s1300_s25, %s1039_s29 }
  0x42   : > { %p1036_p10 = pnand %p1034_p8, %p1020_p0  ;;  %p1042_p7 = scmp.lt.s32.totalorder %s1040_s23, %s1033_s27 }
  0x44   : > { %p1037_p13 = pneg %p1036_p10  ;;  %p1043_p9 = por %p1042_p7, %p1041_p3 }
  0x46   : > { %p1044_p2 = pnand %p1043_p9, %p1037_p13 }
  0x48   : > { %1047 = shalt.err (!%p1044_p2)
}
  0x49   : > { %923 = dma.hbm_to_vmem [thread:$0]  (!%p1296_p11), %s1294_s4, 128, %s1300_s25, %s155_s5  }
  0x4a   : > { %p1475_p5 = scmp.ne.s32.totalorder %s1470_s20, 0 }
  0x4b   : > { %s1330_s30 = sand.u32 (!%p1475_p5), 1, %s1142_s13   ;;  %p1476_p0 = scmp.ne.s32.totalorder (!%p1475_p5), %s1468_s18, 0 }
  0x4c   : > { %174 = sbr.rel (%p1475_p5) target bundleno = 1227 (0x4cb), region = 28  ;;  %s851_s22 = sshll.u32 (!%p1475_p5), %s1330_s30, 3 }
  0x4d   : > { %s177_s6 = scalar_lea.sflag (!%p1475_p5), [#allocation3], %s1330_s30  ;;  %s180_s7 = scalar_lea.vmem (!%p1475_p5), [#allocation2], %s851_s22 }
  0x53   : > { %1121 = dma.done.wait (%p1476_p0), %s177_s6, 128  }
  0x54   : > { %1123 = vsyncadd (%p1476_p0), %s177_s6, 4294967168  ;;  %p1477_p1 = scmp.eq.s32.totalorder %s1215_s16, 0 }
  0x56   : > { %1125 = dma.done.wait (%p1477_p1), [#allocation6], 1536   ;;  %p1478_p11 = pmov %p1477_p1 }
  0x57   : > { %v1156_v0 = vmov 0.0   ;;  %v212_v1 = vld [vmem:[#allocation5 + $0x8] sm:$0xff]  ;;  %v215_v2 = vld [vmem:[#allocation5 + $0x20] sm:$0xff]  ;;  %v214_v5 = vld [vmem:[#allocation5 + $0x18] sm:$0xff]  ;;  %vm223_vm0 = vcmask 261120   ;;  %vm1157_vm1 = vmmov 0   ;;  %v535_v37 = vlaneseq }
  0x58   : > { %1127 = vsyncadd (%p1478_p11), [#allocation6], 4294965760  ;;  %291 = vmatprep.mubr.f32.mxu0 %v1156_v0  ;;  %v211_v3 = vld [vmem:[#allocation5] sm:$0xff]  ;;  %v892_v4 = vpack.c.bf16 %v215_v2, %v212_v1  ;;  %v218_v6 = vld [vmem:[#allocation5 + $0x38] sm:$0xff]  ;;  %879 = vmatprep.mubr.msk.f32.mxu1 %vm1157_vm1, %v1156_v0  ;;  %vm369_vm2 = vcmask 130048   ;;  %v1158_v20 = vmov 0.0|0.0  }
  0x59   : > { %v221_v7 = vld [vmem:[#allocation5 + $0x50] sm:$0xff]  ;;  %v894_v8 = vpack.c.bf16 %v214_v5, %v211_v3  ;;  %v220_v11 = vld [vmem:[#allocation5 + $0x48] sm:$0xff]  ;;  %v219_v19 = vld [vmem:[#allocation5 + $0x40] sm:$0xff]  ;;  %900 = vmatprep.subr.bf16.mxu1 %v1158_v20  ;;  %vm446_vm3 = vcmask 64512   ;;  %v1159_v35 = vmov 1983009808  }
  0x5a   : > { %v896_v9 = vpack.c.bf16 %v221_v7, %v218_v6  ;;  %v217_v10 = vld [vmem:[#allocation5 + $0x30] sm:$0xff]  ;;  %893 = vmatprep.subr.bf16.mxu0 %v892_v4  ;;  %v216_v18 = vld [vmem:[#allocation5 + $0x28] sm:$0xff]  ;;  %v222_v22 = vld [vmem:[#allocation5 + $0x58] sm:$0xff]  ;;  %v533_v36 = vunpack.c.l.s4 %v1159_v35  ;;  %v1160_v38 = vmov 1934713408   ;;  %v536_v41 = vshrl.u32 %v535_v37, 7 }
  0x5b   : > { %895 = vmatpush1.bf16.msra.mxu0 %v894_v8  ;;  %v898_v12 = vpack.c.bf16 %v220_v11, %v217_v10  ;;  %v210_v13 = vld [vmem:[%s180_s7] sm:$0xff]  ;;  %v904_v23 = vpack.c.bf16 %v222_v22, %v219_v19  ;;  %v548_v39 = vunpack.c.l.s4 %v1160_v38  ;;  %s1161_s18 = smov 8   ;;  %s1162_s20 = smov 16   ;;  %vm700_vm4 = vcmask 195584  }
  0x5c   : > { %897 = vmatprep.subr.bf16.mxu0 %v896_v9  ;;  %v213_v17 = vld [vmem:[#allocation5 + $0x10] sm:$0xff]  ;;  %v534_v40 = vunpack.c.0.s8 %v533_v36  ;;  %s1163_s4 = smov 32   ;;  %s1164_s25 = smov 24   ;;  %vm612_vm5 = vcmask 523264   ;;  %vm703_vm6 = vcmask 326656   ;;  %vm610_vm7 = vcmask 392192  }
  0x5d   : > { %v901_v21 = vpack.c.bf16 %v216_v18, %v213_v17  ;;  %v549_v42 = vunpack.c.0.s8 %v548_v39  ;;  %s1165_s26 = smov 40   ;;  %s1166_s5 = smov 48   ;;  %vm614_vm8 = vcmask 654336   ;;  %vm616_vm9 = vcmask 785408  }
  0x5e   : > { %v537_v43 = vsub.s32 %v534_v40, %v536_v41  ;;  %s1167_s8 = smov 80   ;;  %s1168_s9 = smov 96   ;;  %vm706_vm10 = vcmask 457728   ;;  %vm618_vm11 = vcmask 916480  }
  0x5f   : > { %899 = vmatpush1.bf16.msra.mxu0 %v898_v12  ;;  %902 = vmatpush3.bf16.msra.mxu1 %v901_v21  ;;  %v552_v46 = vsub.s32 %v549_v42, %v536_v41  ;;  %s1169_s10 = smov 64   ;;  %s1170_s11 = smov 112  }
  0x60   : > { %882 = vmatprep.subr.mxu0 %v1156_v0  ;;  %903 = vmatprep.subr.bf16.mxu1 %v1158_v20  ;;  %s1171_s27 = smov 56   ;;  %s858_s28 = sshll.u32 %s1215_s16, 4 }
  0x61   : > { %s203_s29 = scalar_lea.vmem [#allocation7], %s1330_s30  ;;  %s209_s22 = scalar_lea.vmem [#allocation8], %s1330_s30 }
  0x62   : > { %853 = vmatmul.mubr.msk.f32.vlgmr.msra.gmra.mrb[0].mxu0 %vm223_vm0, %v210_v13  ;;  %s727_s23 = sshll.u32 %s203_s29, 4  ;;  %s740_s6 = sshll.u32 %s209_s22, 4  ;;  %s1389_s23 = int_to_ptr.vmem [resolvable:$true] %s727_s23  ;;  %s1396_s6 = int_to_ptr.vmem [resolvable:$true] %s740_s6 }
  0x63   : > { %884 = vmatprep.mubr.msk.f32.mxu0 %vm1157_vm1, %v1156_v0  ;;  %905 = vmatpush3.bf16.msra.mxu1 %v904_v23  ;;  %s1386_s16 = scalar_lea.hbm %s1463_s2, %s858_s28 }
  0x64   : > { %887 = vmatprep.subr.mxu1 %v1156_v0 }
  0x66   : > { %880 = vmatmul.mubr.msk.f32.vlgmr.msra.gmra.mrb[0].mxu1 %vm223_vm0, %v210_v13 }
  0x67   : > { %889 = vmatprep.mubr.msk.f32.mxu1 %vm1157_vm1, %v1156_v0 }
 0x135   : > { %v293_v14 = vpop.f32.mrb[0].mxu0 }
 0x136   : > { %v295_v15 = vpop.f32.mrb[1].mxu0  ;;  %883 = vmatpush3.xpose.msk.msra.mxu0 %vm369_vm2, %v293_v14 }
 0x137   : > { %v368_v16 = vmul.f32 0.25, %v295_v15 }
 0x139   : > { %885 = vmatmul.mubr.msk.f32.vlgmr.msra.gmra.mrb[2].mxu0 %vm369_vm2, %v368_v16  ;;  %v364_v32 = vpop.f32.mrb[0].mxu1 }
 0x13a   : > { %v881_v33 = vpop.f32.mrb[1].mxu1  ;;  %888 = vmatpush3.msra.mxu1 %v364_v32 }
 0x20c   : > { %v442_v24 = vpop.f32.mrb[2].mxu0 }
 0x20d   : > { %v886_v25 = vpop.f32.mrb[3].mxu0  ;;  %v447_v26 = vsel %vm446_vm3, %v442_v24, -inf }
 0x20e   : > { %448 = vmax.xlane.f32.xlu0 %v447_v26 }
 0x29b   : > { %v449_v27 = vpop.xlane.xlu0 %448 }
 0x29c   : > { %v450_v28 = vsub.f32 %v442_v24, %v449_v27 }
 0x29e   : > { %v451_v29 = vmul.f32 1.442695, %v450_v28 }
 0x2a0   : > { %986 = vpow2.f32 %v451_v29 }
 0x2aa   : > { %v987_v30 = vpop.eup %986 }
 0x2ab   : > { %v453_v31 = vsel %vm446_vm3, %v987_v30, 0.0 }
 0x2ac   : > { %454 = vadd.xlane.f32.xlu0 %v453_v31 }
 0x339   : > { %v455_v34 = vpop.xlane.xlu0 %454 }
 0x33a   : > { %988 = vrcp.f32 %v455_v34 }
 0x344   : > { %v989_v44 = vpop.eup %988 }
 0x345   : > { %v457_v45 = vmul.f32 %v989_v44, %v987_v30 }
 0x347   : > { %890 = vmatmul.mubr.msk.f32.vlgmr.msra.gmra.mrb[2].mxu1 %vm446_vm3, %v457_v45  ;;  %v628_v47 = vrot.slane %v457_v45, %v537_v43  ;;  %v621_v48 = vcombine.high %v457_v45, %v1156_v0 }
 0x349   : > { %v643_v49 = vrot.slane %v628_v47, %v552_v46  ;;  %v636_v50 = vcombine.high %v628_v47, %v1156_v0  ;;  %v635_v53 = vrot.slane %v621_v48, %v537_v43 }
 0x34b   : > { %v666_v51 = vcombine.high %v643_v49, %v1156_v0  ;;  %v650_v52 = vrot.slane %v636_v50, %v552_v46  ;;  %v658_v54 = vrot.slane %v635_v53, %v552_v46  ;;  %v651_v57 = vcombine.high %v635_v53, %v1156_v0 }
 0x34d   : > { %671 = vrot.lane.b32.xlu1 %v666_v51, %s1161_s18  ;;  %675 = vrot.lane.b32.xlu0 %v650_v52, %s1162_s20  ;;  %v667_v55 = vcombine.high %v650_v52, %v1156_v0  ;;  %v668_v56 = vcombine.high %v658_v54, %v1156_v0  ;;  %v665_v58 = vrot.slane %v651_v57, %v552_v46 }
 0x34f   : > { %v669_v11 = vcombine.high %v665_v58, %v1156_v0 }
 0x351   : > { %683 = vrot.lane.b32.xlu1 %v658_v54, %s1163_s4 }
 0x355   : > { %679 = vrot.lane.b32.xlu1 %v667_v55, %s1164_s25  ;;  %s1394_s25 = scalar_lea.hbm %s1464_s3, %s858_s28 }
 0x359   : > { %687 = vrot.lane.b32.xlu1 %v668_v56, %s1165_s26  ;;  %s711_s26 = scalar_lea.sflag [#allocation4], %s1330_s30 }
 0x35d   : > { %691 = vrot.lane.b32.xlu1 %v665_v58, %s1166_s5 }
 0x3bf   : > { %v672_v12 = vpop.permute.xlu1 %671  ;;  %v676_v17 = vpop.permute.xlu0 %675 }
 0x3c0   : > { %v698_v21 = vsel %vm446_vm3, %v643_v49, %v672_v12 }
 0x3c1   : > { %v699_v23 = vsel %vm369_vm2, %v698_v21, %v676_v17 }
 0x3c3   : > { %v684_v13 = vpop.permute.xlu1 %683 }
 0x3c7   : > { %v680_v14 = vpop.permute.xlu1 %679 }
 0x3c8   : > { %v701_v24 = vsel %vm700_vm4, %v699_v23, %v680_v14 }
 0x3c9   : > { %v702_v29 = vsel %vm223_vm0, %v701_v24, %v684_v13 }
 0x3cb   : > { %v688_v15 = vpop.permute.xlu1 %687 }
 0x3cc   : > { %v704_v31 = vsel %vm703_vm6, %v702_v29, %v688_v15 }
 0x3cf   : > { %v692_v16 = vpop.permute.xlu1 %691 }
 0x3d0   : > { %v705_v33 = vsel %vm610_vm7, %v704_v31, %v692_v16 }
 0x41a   : > { %v527_v59 = vpop.f32.mrb[2].mxu1 }
 0x41b   : > { %v531_v60 = vcombine.high %v527_v59, %v1156_v0  ;;  %v538_v61 = vrot.slane %v527_v59, %v537_v43  ;;  %v891_v62 = vpop.f32.mrb[3].mxu1 }
 0x41d   : > { %v545_v63 = vrot.slane %v531_v60, %v537_v43  ;;  %v553_v1 = vrot.slane %v538_v61, %v552_v46  ;;  %v546_v2 = vcombine.high %v538_v61, %v1156_v0 }
 0x41f   : > { %v568_v3 = vrot.slane %v545_v63, %v552_v46  ;;  %v576_v4 = vcombine.high %v553_v1, %v1156_v0  ;;  %v561_v5 = vcombine.high %v545_v63, %v1156_v0  ;;  %v560_v7 = vrot.slane %v546_v2, %v552_v46 }
 0x421   : > { %581 = vrot.lane.b32.xlu1 %v576_v4, %s1162_s20  ;;  %v578_v6 = vcombine.high %v568_v3, %v1156_v0  ;;  %v575_v8 = vrot.slane %v561_v5, %v552_v46  ;;  %v577_v10 = vcombine.high %v560_v7, %v1156_v0 }
 0x423   : > { %597 = vrot.lane.b32.xlu0 %v578_v6, %s1167_s8  ;;  %v579_v9 = vcombine.high %v575_v8, %v1156_v0  ;;  %s1172_s8 = smov [#allocation7]  }
 0x425   : > { %585 = vrot.lane.b32.xlu1 %v560_v7, %s1163_s4 }
 0x427   : > { %601 = vrot.lane.b32.xlu0 %v575_v8, %s1168_s9  ;;  %s1052_s9 = sshll.u32 %s1172_s8, 4  ;;  %s1053_s9 = int_to_ptr.vmem [resolvable:$false] %s1052_s9 }
 0x428   : > { %p1055_p10 = scmp.lt.s32.totalorder %s1389_s23, %s1053_s9 }
 0x429   : > { %593 = vrot.lane.b32.xlu1 %v568_v3, %s1169_s10  ;;  %s1054_s10 = scalar_lea.vmem %s1053_s9, 32 }
 0x42b   : > { %605 = vrot.lane.b32.xlu0 %v579_v9, %s1170_s11 }
 0x42d   : > { %589 = vrot.lane.b32.xlu1 %v577_v10, %s1166_s5  ;;  %s1048_s5 = scalar_lea.vmem %s1389_s23, 16 }
 0x42e   : > { %p1049_p4 = scmp.ne.s32.totalorder %s1389_s23, %s1048_s5  ;;  %p1056_p13 = scmp.lt.s32.totalorder %s1054_s10, %s1048_s5 }
 0x430   : > { %p1050_p6 = pnand %p1049_p4, %p1285_p12  ;;  %p1057_p3 = por %p1056_p13, %p1055_p10 }
 0x431   : > { %695 = vrot.lane.b32.xlu1 %v669_v11, %s1171_s27 }
 0x432   : > { %p1051_p8 = pneg %p1050_p6 }
 0x434   : > { %p1058_p7 = pnand %p1057_p3, %p1051_p8 }
 0x493   : > { %v582_v18 = vpop.permute.xlu1 %581 }
 0x494   : > { %v608_v25 = vsel %vm369_vm2, %v553_v1, %v582_v18 }
 0x495   : > { %v598_v19 = vpop.permute.xlu0 %597 }
 0x497   : > { %v586_v20 = vpop.permute.xlu1 %585 }
 0x498   : > { %v609_v26 = vsel %vm223_vm0, %v608_v25, %v586_v20 }
 0x499   : > { %v602_v0 = vpop.permute.xlu0 %601 }
 0x49b   : > { %v594_v22 = vpop.permute.xlu1 %593 }
 0x49d   : > { %v606_v34 = vpop.permute.xlu0 %605 }
 0x49f   : > { %v590_v27 = vpop.permute.xlu1 %589 }
 0x4a0   : > { %v611_v28 = vsel %vm610_vm7, %v609_v26, %v590_v27 }
 0x4a1   : > { %v613_v30 = vsel %vm612_vm5, %v611_v28, %v594_v22 }
 0x4a2   : > { %v615_v32 = vsel %vm614_vm8, %v613_v30, %v598_v19 }
 0x4a3   : > { %v696_v35 = vpop.permute.xlu1 %695  ;;  %v617_v36 = vsel %vm616_vm9, %v615_v32, %v602_v0 }
 0x4a4   : > { %v707_v37 = vsel %vm706_vm10, %v705_v33, %v696_v35  ;;  %v619_v38 = vsel %vm618_vm11, %v617_v36, %v606_v34 }
 0x4a5   : > { %v708_v39 = vsel %vm612_vm5, %v707_v37, 0.0  ;;  %620 = vst [vmem:[%s203_s29] sm:$0x1] %v619_v38 }
 0x4a6   : > { %709 = vst [vmem:[%s209_s22] sm:$0x1] %v708_v39 }
 0x4a7   : > { %1061 = shalt.err (!%p1058_p7)
}
 0x4a8   : > { %s1062_s11 = scalar_lea.hbm %s1386_s16, 16  ;;  %s1066_s29 = scalar_lea.hbm %s1463_s2, 32 }
 0x4a9   : > { %p1063_p9 = scmp.ne.s32.totalorder %s1386_s16, %s1062_s11  ;;  %p1067_p0 = scmp.lt.u32.totalorder %s1386_s16, %s1463_s2 }
 0x4aa   : > { %p1068_p1 = scmp.lt.u32.totalorder %s1066_s29, %s1062_s11  ;;  %p1070_p4 = scmp.lt.u32.totalorder %s1062_s11, %s1386_s16 }
 0x4ab   : > { %p1064_p2 = pnand %p1063_p9, %p1285_p12 }
 0x4ac   : > { %p1069_p11 = por %p1068_p1, %p1067_p0 }
 0x4ad   : > { %p1065_p5 = pneg %p1064_p2 }
 0x4ae   : > { %p1071_p6 = por %p1070_p4, %p1069_p11 }
 0x4b0   : > { %p1072_p8 = pnand %p1071_p6, %p1065_p5 }
 0x4b2   : > { %1075 = shalt.err (!%p1072_p8)
}
 0x4b3   : > { %912 = dma.vmem_to_hbm [thread:$0]  (%p1285_p12), %s1389_s23, 16, %s1386_s16, %s711_s26  }
 0x4b4   : > { %s715_s18 = scalar_lea.sflag [#allocation9], %s1330_s30  ;;  %s1076_s20 = scalar_lea.vmem %s1396_s6, 16 }
 0x4b5   : > { %p1077_p10 = scmp.ne.s32.totalorder %s1396_s6, %s1076_s20  ;;  %s1173_s4 = smov [#allocation8]  }
 0x4b6   : > { %s1080_s5 = sshll.u32 %s1173_s4, 4  ;;  %s1081_s5 = int_to_ptr.vmem [resolvable:$false] %s1080_s5 }
 0x4b7   : > { %p1078_p13 = pnand %p1077_p10, %p1285_p12  ;;  %s1082_s8 = scalar_lea.vmem %s1081_s5, 32 }
 0x4b8   : > { %p1083_p7 = scmp.lt.s32.totalorder %s1396_s6, %s1081_s5  ;;  %p1084_p9 = scmp.lt.s32.totalorder %s1082_s8, %s1076_s20 }
 0x4b9   : > { %p1079_p3 = pneg %p1078_p13 }
 0x4ba   : > { %p1085_p2 = por %p1084_p9, %p1083_p7 }
 0x4bc   : > { %p1086_p5 = pnand %p1085_p2, %p1079_p3 }
 0x4be   : > { %1089 = shalt.err (!%p1086_p5)
}
 0x4bf   : > { %s1090_s30 = scalar_lea.hbm %s1394_s25, 16  ;;  %s1094_s26 = scalar_lea.hbm %s1464_s3, 32 }
 0x4c0   : > { %p1091_p0 = scmp.ne.s32.totalorder %s1394_s25, %s1090_s30  ;;  %p1095_p4 = scmp.lt.u32.totalorder %s1394_s25, %s1464_s3 }
 0x4c1   : > { %p1096_p6 = scmp.lt.u32.totalorder %s1094_s26, %s1090_s30  ;;  %p1098_p10 = scmp.lt.u32.totalorder %s1090_s30, %s1394_s25 }
 0x4c2   : > { %p1092_p1 = pnand %p1091_p0, %p1285_p12 }
 0x4c3   : > { %p1097_p8 = por %p1096_p6, %p1095_p4 }
 0x4c4   : > { %p1093_p11 = pneg %p1092_p1 }
 0x4c5   : > { %p1099_p13 = por %p1098_p10, %p1097_p8 }
 0x4c7   : > { %p1100_p3 = pnand %p1099_p13, %p1093_p11 }
 0x4c9   : > { %1103 = shalt.err (!%p1100_p3)
}
 0x4ca   : > { %913 = dma.vmem_to_hbm [thread:$0]  (%p1285_p12), %s1396_s6, 16, %s1394_s25, %s715_s18  }
 0x4cb PF: > { %s752_s11 = sand.u32 1, %s1138_s12   ;;  %p1479_p7 = scmp.ne.s32.totalorder %s1469_s19, 0 }
 0x4cc   : > { %p1480_p9 = scmp.ge.s32.totalorder %s1150_s15, 2  ;;  %s753_s27 = scalar_lea.sflag [#allocation4], %s752_s11 }
 0x4ce   : > { %p925_p2 = pnand %p1480_p9, %p1479_p7 }
 0x4d0   : > { %1129 = dma.done.wait (!%p925_p2), %s753_s27, 16  }
 0x4d1   : > { %1131 = vsyncadd (!%p925_p2), %s753_s27, 4294967280  ;;  %s761_s28 = scalar_lea.sflag [#allocation9], %s752_s11 }
 0x4d2   : > { %1133 = dma.done.wait (!%p925_p2), %s761_s28, 16  }
 0x4d3   : > { %1135 = vsyncadd (!%p925_p2), %s761_s28, 4294967280  ;;  %p21_p12 = scmp.ge.s32.totalorder %s1250_s24, 4   ;;  %s1481_s12 = smov %s1142_s13 }
 0x4d4   : > { %s1482_s13 = smov %s1146_s14  ;;  %s1483_s14 = smov %s1281_s17 }
 0x4d5   : > { %s1484_s15 = smov %s1250_s24  ;;  %23 = sbr.rel (!%p21_p12) target bundleno = 8 (0x8), region = 94 }
 0x4dc   :  { %765 = vsyncpa [#allocation3], 1 }
 0x4dd   :  { %767 = vsyncpa [#allocation3 + $0x1], 1 }
 0x4de   :  { %768 = vsyncpa [#allocation6], 1 }
 0x4df   :  { %769 = vsyncpa [#allocation4], 1 }
 0x4e0   :  { %771 = vsyncpa [#allocation4 + $0x1], 1 }
 0x4e1   :  { %772 = vsyncpa [#allocation9], 1 }
 0x4e2   :  { %774 = vsyncpa [#allocation9 + $0x1], 1 }

</bundles_post_ra>
